<compile_context>
chip_gen: v5e
topology: v5e:2x2
jax: 0.10.0
libtpu: 0.0.40
codegen_flags: <defaults>
</compile_context>

<pallas_src>
import functools

import jax
import jax.numpy as jnp
from jax import lax
from jax.experimental import pallas as pl
from jax.experimental.pallas import tpu as pltpu

# --- module hyperparameters (BEXPRMSEIOULoss defaults) ---
A_COEF = 6.0
B_COEF = 0.8
MAX_VALUE = 80.0
IOU_THRESHOLDS = tuple(t / MAX_VALUE for t in (15.0, 35.0))   # (0.1875, 0.4375)
IOU_WEIGHT = 0.005

LANES = 128
MAX_BLOCK_ROWS = 2048        # 2048*128*4B = 1 MiB per f32 input tile (x2 inputs x2 buffers = 4 MiB)
NPARTS = 2                   # leading "parallel" grid axis (both TCs on v7x; near-free on 1-TC chips)
MIN_PALLAS_ELEMENTS = 2048   # below this the fixed pallas_call overhead dominates -> pure jnp


def _round_up(x, m):
    return (x + m - 1) // m * m


def _canon_dtype(x):
    # Keep narrow float storage types (halved HBM bytes); upcast anything else to f32.
    if x.dtype in (jnp.float32, jnp.bfloat16, jnp.float16):
        return x
    return x.astype(jnp.float32)


def _loss_sums_kernel(yp_ref, yt_ref, out_ref, acc_ref, *, rows_total, block_rows, bpp):
    """Accumulate per-lane partial sums for BEXPRMSEIOULoss.

    yp_ref / yt_ref : (block_rows, 128) input tiles in storage dtype (upcast in-kernel).
    out_ref         : (1, 8, 128) f32 output block, one per leading grid part.
    acc_ref         : (8, 128) f32 VMEM scratch, persistent across the reduction axis.
        row 0       : sum of  (yp - yt)^2 * (exp(6*yt) - 0.8)
        row 1 + 2t  : sum of  [yp >= thr_t] + [yt >= thr_t]    (union = this - hits)
        row 2 + 2t  : sum of  [yp >= thr_t] * [yt >= thr_t]    (hits)
        rows 5..7   : unused (zero)
    """
    i = pl.program_id(0)
    j = pl.program_id(1)

    @pl.when(j == 0)
    def _init():
        acc_ref[...] = jnp.zeros_like(acc_ref)

    def accumulate(yp, yt):
        d = yp - yt
        w = jnp.exp(yt * A_COEF) - B_COEF            # EUP; masked zeros give d == 0 anyway
        acc_ref[0:1, :] += jnp.sum(d * d * w, axis=0, keepdims=True)
        for t, thr in enumerate(IOU_THRESHOLDS):     # static unroll (2 thresholds)
            mp = yp >= thr
            mt = yt >= thr
            hits = jnp.where(mp & mt, 1.0, 0.0)
            cnt = jnp.where(mp, 1.0, 0.0) + jnp.where(mt, 1.0, 0.0)
            acc_ref[1 + 2 * t:2 + 2 * t, :] += jnp.sum(cnt, axis=0, keepdims=True)
            acc_ref[2 + 2 * t:3 + 2 * t, :] += jnp.sum(hits, axis=0, keepdims=True)

    start_row = (i * bpp + j) * block_rows           # logical (unclamped) block start
    is_full = start_row + block_rows <= rows_total

    @pl.when(is_full)
    def _full_block():
        accumulate(yp_ref[...].astype(jnp.float32), yt_ref[...].astype(jnp.float32))

    @pl.when(jnp.logical_not(is_full))
    def _ragged_block():
        # Ragged last block (or a clamped duplicate step, where valid <= 0 -> all masked).
        valid = rows_total - start_row
        row_ids = lax.broadcasted_iota(jnp.int32, (block_rows, LANES), 0)
        keep = row_ids < valid
        accumulate(jnp.where(keep, yp_ref[...].astype(jnp.float32), 0.0),
                   jnp.where(keep, yt_ref[...].astype(jnp.float32), 0.0))

    @pl.when(j == pl.num_programs(1) - 1)
    def _write_out():
        out_ref[...] = acc_ref[...][None]


def _loss_reference(y_pre, y_true):
    """Pure-jnp mirror of the PyTorch BEXPRMSEIOULoss forward (also the small-input path)."""
    yp = y_pre.astype(jnp.float32)
    yt = y_true.astype(jnp.float32)
    n = yp.size
    w = jnp.exp(yt * A_COEF) - B_COEF
    total = jnp.sqrt(jnp.sum((yp - yt) ** 2 * w / n))
    for thr in IOU_THRESHOLDS:
        pb = (yp >= thr).astype(jnp.float32)
        tb = (yt >= thr).astype(jnp.float32)
        hits = jnp.sum(pb * tb)
        union = jnp.sum(pb) + jnp.sum(tb) - hits
        iou = jnp.where(union > 0, hits / jnp.where(union > 0, union, 1.0), 1.0)
        total = total + IOU_WEIGHT * (1.0 - iou)
    return total


@jax.jit
def bexprmse_iou_loss(y_pre, y_true):
    """Forward pass of BEXPRMSEIOULoss; y_true is expected to lie in [0, 1]."""
    assert y_pre.shape == y_true.shape
    n = y_pre.size

    if n < MIN_PALLAS_ELEMENTS:
        # At this size the kernel is pure fixed overhead; XLA-fused jnp wins.
        return _loss_reference(y_pre, y_true)

    yp = _canon_dtype(y_pre).reshape(-1)     # flatten: free for contiguous inputs
    yt = _canon_dtype(y_true).reshape(-1)

    rows = n // LANES
    m = rows * LANES
    tail = n - m

    if tail:
        # Only when n % 128 != 0: prefix slice may materialize a copy, still far cheaper
        # than the old pad-to-grid-granularity copy of both inputs.
        yp_main = lax.slice(yp, (0,), (m,)).reshape(rows, LANES)
        yt_main = lax.slice(yt, (0,), (m,)).reshape(rows, LANES)
    else:
        yp_main = yp.reshape(rows, LANES)    # copy-free lane-dense repack
        yt_main = yt.reshape(rows, LANES)

    # Tile geometry: block_rows multiple of 16 (bf16/f16 min tile), capped at MAX_BLOCK_ROWS.
    block_rows = min(MAX_BLOCK_ROWS, _round_up(pl.cdiv(rows, NPARTS), 16))
    num_blocks = pl.cdiv(rows, block_rows)
    nparts = min(NPARTS, num_blocks)         # no parallel split if there is a single block
    bpp = pl.cdiv(num_blocks, nparts)        # row-blocks per part
    grid = (nparts, bpp)

    kernel = functools.partial(_loss_sums_kernel, rows_total=rows,
                               block_rows=block_rows, bpp=bpp)

    def in_index_map(i, j):
        # Clamp so an overhanging grid step re-reads the last real block (its contribution
        # is masked to zero in-kernel) instead of issuing an out-of-bounds DMA.
        return (jnp.minimum(i * bpp + j, num_blocks - 1), 0)

    in_spec = pl.BlockSpec((block_rows, LANES), in_index_map)
    bytes_in = n * (yp_main.dtype.itemsize + yt_main.dtype.itemsize)

    sums = pl.pallas_call(
        kernel,
        out_shape=jax.ShapeDtypeStruct((nparts, 8, LANES), jnp.float32),
        grid=grid,
        in_specs=[in_spec, in_spec],
        out_specs=pl.BlockSpec((1, 8, LANES), lambda i, j: (i, 0, 0)),
        scratch_shapes=[pltpu.VMEM((8, LANES), jnp.float32)],
        compiler_params=pltpu.CompilerParams(
            # TODO(synk): on v7x verify the leading axis actually shards across both
            # TensorCores (xprof); if not, switch to pltpu.CORE_PARALLEL / pl.core_map.
            dimension_semantics=("parallel", "arbitrary"),
            vmem_limit_bytes=32 * 1024 * 1024),
        cost_estimate=pl.CostEstimate(
            flops=22 * n, transcendentals=n,
            bytes_accessed=bytes_in + nparts * 8 * LANES * 4),
    )(yp_main, yt_main)

    s = jnp.sum(sums, axis=(0, 2))           # (8,) global partial sums

    # < 128-element tail (only when n % 128 != 0): plain jnp, negligible work.
    if tail:
        yp_t = yp[m:].astype(jnp.float32)
        yt_t = yt[m:].astype(jnp.float32)
        d_t = yp_t - yt_t
        tail_wmse = jnp.sum(d_t * d_t * (jnp.exp(yt_t * A_COEF) - B_COEF))
        tail_cnt, tail_hits = [], []
        for thr in IOU_THRESHOLDS:
            pb = (yp_t >= thr).astype(jnp.float32)
            tb = (yt_t >= thr).astype(jnp.float32)
            tail_cnt.append(jnp.sum(pb + tb))
            tail_hits.append(jnp.sum(pb * tb))
    else:
        tail_wmse = 0.0
        tail_cnt = [0.0] * len(IOU_THRESHOLDS)
        tail_hits = [0.0] * len(IOU_THRESHOLDS)

    # BEXPRMSELoss: sqrt( sum(w * diff^2) / N )
    total = jnp.sqrt((s[0] + tail_wmse) / n)
    # IOU losses: 0.005 * (1 - hits / union), union = sum(pb) + sum(tb) - hits.
    for t in range(len(IOU_THRESHOLDS)):
        hits = s[2 + 2 * t] + tail_hits[t]
        union = (s[1 + 2 * t] + tail_cnt[t]) - hits
        # Guard the all-below-threshold case (union == 0) that would NaN in the original.
        iou = jnp.where(union > 0, hits / jnp.where(union > 0, union, 1.0), 1.0)
        total = total + IOU_WEIGHT * (1.0 - iou)
    return total


if __name__ == "__main__":
    key = jax.random.PRNGKey(0)

    cases = [
        (2, 4, 16, 16),      # spec-consistent small case (single grid step)
        (3, 5, 60, 50),      # n % 128 != 0 -> ragged last block + jnp tail epilogue
        (2, 4, 256, 320),    # multi-block reduction, 2-part split, clamped overhang step
    ]

    last_loss = None
    for idx, shape in enumerate(cases):
        k1, k2 = jax.random.split(jax.random.fold_in(key, idx))
        y_true = jax.random.uniform(k1, shape, dtype=jnp.float32)          # in [0, 1]
        y_pre = jnp.clip(
            y_true + 0.1 * jax.random.normal(k2, shape, dtype=jnp.float32),
            0.0, 1.0)

        loss = bexprmse_iou_loss(y_pre, y_true)
        jax.block_until_ready(loss)
        ref = _loss_reference(y_pre, y_true)
        assert abs(float(loss) - float(ref)) < 1e-3, (shape, float(loss), float(ref))
        last_loss = loss

    jax.block_until_ready(last_loss)
    print("KERNEL_OK")
</pallas_src>

<mosaic_0001>
module attributes {stable_mosaic.version = 11 : i64} {
  func.func @_loss_sums_kernel(%arg0: i32, %arg1: i32, %arg2: memref<16x128xf32, #tpu.memory_space<vmem>>, %arg3: memref<16x128xf32, #tpu.memory_space<vmem>>, %arg4: memref<1x8x128xf32, #tpu.memory_space<vmem>>, %arg5: memref<8x128xf32, #tpu.memory_space<vmem>>) attributes {dimension_semantics = [#tpu.dimension_semantics<parallel>, #tpu.dimension_semantics<arbitrary>], iteration_bounds = array<i64: 1, 1>, scalar_prefetch = 0 : i64, scratch_operands = 1 : i64, tpu.core_type = #tpu.core_type<tc>, window_params = [{transform_indices = @transform_0, window_bounds = array<i64: 16, 128>}, {transform_indices = @transform_1, window_bounds = array<i64: 16, 128>}, {transform_indices = @transform_2, window_bounds = array<i64: 1, 8, 128>}]} {
    %c0_i32 = arith.constant 0 : i32
    %0 = arith.cmpi eq, %arg1, %c0_i32 : i32
    %1 = arith.extui %0 : i1 to i32
    %c0_i32_0 = arith.constant 0 : i32
    %2 = arith.cmpi ne, %1, %c0_i32_0 : i32
    scf.if %2 {
      %cst = arith.constant 0.000000e+00 : f32
      %16 = vector.broadcast %cst : f32 to vector<8x128xf32>
      %c0 = arith.constant 0 : index
      %c0_7 = arith.constant 0 : index
      %17 = vector.load %arg5[%c0, %c0_7] : memref<8x128xf32, #tpu.memory_space<vmem>>, vector<8x128xf32>
      tpu.vector_store %arg5[%c0, %c0_7], %16 {strides = array<i32>} : memref<8x128xf32, #tpu.memory_space<vmem>>, vector<8x128xf32>,
    } else {
    }
    %c1_i32 = arith.constant 1 : i32
    %3 = arith.muli %arg0, %c1_i32 : i32
    %4 = arith.addi %3, %arg1 : i32
    %c16_i32 = arith.constant 16 : i32
    %5 = arith.muli %4, %c16_i32 : i32
    %c16_i32_1 = arith.constant 16 : i32
    %6 = arith.addi %5, %c16_i32_1 : i32
    %c16_i32_2 = arith.constant 16 : i32
    %7 = arith.cmpi sle, %6, %c16_i32_2 : i32
    %8 = arith.extui %7 : i1 to i32
    %c0_i32_3 = arith.constant 0 : i32
    %9 = arith.cmpi ne, %8, %c0_i32_3 : i32
    scf.if %9 {
      %c0 = arith.constant 0 : index
      %c0_7 = arith.constant 0 : index
      %16 = vector.load %arg2[%c0, %c0_7] : memref<16x128xf32, #tpu.memory_space<vmem>>, vector<16x128xf32>
      %c0_8 = arith.constant 0 : index
      %c0_9 = arith.constant 0 : index
      %17 = vector.load %arg3[%c0_8, %c0_9] : memref<16x128xf32, #tpu.memory_space<vmem>>, vector<16x128xf32>
      %18 = arith.subf %16, %17 : vector<16x128xf32>
      %cst = arith.constant 6.000000e+00 : f32
      %19 = vector.broadcast %cst : f32 to vector<16x128xf32>
      %20 = arith.mulf %17, %19 : vector<16x128xf32>
      %21 = math.exp %20 : vector<16x128xf32>
      %cst_10 = arith.constant 8.000000e-01 : f32
      %22 = vector.broadcast %cst_10 : f32 to vector<16x128xf32>
      %23 = arith.subf %21, %22 : vector<16x128xf32>
      %c0_11 = arith.constant 0 : index
      %c0_12 = arith.constant 0 : index
      %24 = vector.load %arg5[%c0_11, %c0_12] : memref<8x128xf32, #tpu.memory_space<vmem>>, vector<1x128xf32>
      %25 = arith.mulf %18, %18 : vector<16x128xf32>
      %26 = arith.mulf %25, %23 : vector<16x128xf32>
      %cst_13 = arith.constant dense<0.000000e+00> : vector<128xf32>
      %27 = vector.multi_reduction <add>, %26, %cst_13 [0] : vector<16x128xf32> to vector<128xf32>
      %28 = vector.shape_cast %27 : vector<128xf32> to vector<1x128xf32>
      %29 = arith.addf %24, %28 : vector<1x128xf32>
      %c0_14 = arith.constant 0 : index
      %c0_15 = arith.constant 0 : index
      %30 = vector.load %arg5[%c0_14, %c0_15] : memref<8x128xf32, #tpu.memory_space<vmem>>, vector<1x128xf32>
      tpu.vector_store %arg5[%c0_14, %c0_15], %29 {strides = array<i32>} : memref<8x128xf32, #tpu.memory_space<vmem>>, vector<1x128xf32>,
      %cst_16 = arith.constant 1.875000e-01 : f32
      %31 = vector.broadcast %cst_16 : f32 to vector<16x128xf32>
      %32 = arith.cmpf oge, %16, %31 : vector<16x128xf32>
      %cst_17 = arith.constant 1.875000e-01 : f32
      %33 = vector.broadcast %cst_17 : f32 to vector<16x128xf32>
      %34 = arith.cmpf oge, %17, %33 : vector<16x128xf32>
      %35 = arith.andi %32, %34 : vector<16x128xi1>
      %cst_18 = arith.constant 1.000000e+00 : f32
      %cst_19 = arith.constant 0.000000e+00 : f32
      %36 = vector.broadcast %cst_18 : f32 to vector<16x128xf32>
      %37 = vector.broadcast %cst_19 : f32 to vector<16x128xf32>
      %38 = arith.select %35, %36, %37 : vector<16x128xi1>, vector<16x128xf32>
      %cst_20 = arith.constant 1.000000e+00 : f32
      %cst_21 = arith.constant 0.000000e+00 : f32
      %39 = vector.broadcast %cst_20 : f32 to vector<16x128xf32>
      %40 = vector.broadcast %cst_21 : f32 to vector<16x128xf32>
      %41 = arith.select %32, %39, %40 : vector<16x128xi1>, vector<16x128xf32>
      %cst_22 = arith.constant 1.000000e+00 : f32
      %cst_23 = arith.constant 0.000000e+00 : f32
      %42 = vector.broadcast %cst_22 : f32 to vector<16x128xf32>
      %43 = vector.broadcast %cst_23 : f32 to vector<16x128xf32>
      %44 = arith.select %34, %42, %43 : vector<16x128xi1>, vector<16x128xf32>
      %45 = arith.addf %41, %44 : vector<16x128xf32>
      %c1 = arith.constant 1 : index
      %c0_24 = arith.constant 0 : index
      %46 = vector.load %arg5[%c1, %c0_24] : memref<8x128xf32, #tpu.memory_space<vmem>>, vector<1x128xf32>
      %cst_25 = arith.constant dense<0.000000e+00> : vector<128xf32>
      %47 = vector.multi_reduction <add>, %45, %cst_25 [0] : vector<16x128xf32> to vector<128xf32>
      %48 = vector.shape_cast %47 : vector<128xf32> to vector<1x128xf32>
      %49 = arith.addf %46, %48 : vector<1x128xf32>
      %c1_26 = arith.constant 1 : index
      %c0_27 = arith.constant 0 : index
      %50 = vector.load %arg5[%c1_26, %c0_27] : memref<8x128xf32, #tpu.memory_space<vmem>>, vector<1x128xf32>
      tpu.vector_store %arg5[%c1_26, %c0_27], %49 {strides = array<i32>} : memref<8x128xf32, #tpu.memory_space<vmem>>, vector<1x128xf32>,
      %c2 = arith.constant 2 : index
      %c0_28 = arith.constant 0 : index
      %51 = vector.load %arg5[%c2, %c0_28] : memref<8x128xf32, #tpu.memory_space<vmem>>, vector<1x128xf32>
      %cst_29 = arith.constant dense<0.000000e+00> : vector<128xf32>
      %52 = vector.multi_reduction <add>, %38, %cst_29 [0] : vector<16x128xf32> to vector<128xf32>
      %53 = vector.shape_cast %52 : vector<128xf32> to vector<1x128xf32>
      %54 = arith.addf %51, %53 : vector<1x128xf32>
      %c2_30 = arith.constant 2 : index
      %c0_31 = arith.constant 0 : index
      %55 = vector.load %arg5[%c2_30, %c0_31] : memref<8x128xf32, #tpu.memory_space<vmem>>, vector<1x128xf32>
      tpu.vector_store %arg5[%c2_30, %c0_31], %54 {strides = array<i32>} : memref<8x128xf32, #tpu.memory_space<vmem>>, vector<1x128xf32>,
      %cst_32 = arith.constant 4.375000e-01 : f32
      %56 = vector.broadcast %cst_32 : f32 to vector<16x128xf32>
      %57 = arith.cmpf oge, %16, %56 : vector<16x128xf32>
      %cst_33 = arith.constant 4.375000e-01 : f32
      %58 = vector.broadcast %cst_33 : f32 to vector<16x128xf32>
      %59 = arith.cmpf oge, %17, %58 : vector<16x128xf32>
      %60 = arith.andi %57, %59 : vector<16x128xi1>
      %cst_34 = arith.constant 1.000000e+00 : f32
      %cst_35 = arith.constant 0.000000e+00 : f32
      %61 = vector.broadcast %cst_34 : f32 to vector<16x128xf32>
      %62 = vector.broadcast %cst_35 : f32 to vector<16x128xf32>
      %63 = arith.select %60, %61, %62 : vector<16x128xi1>, vector<16x128xf32>
      %cst_36 = arith.constant 1.000000e+00 : f32
      %cst_37 = arith.constant 0.000000e+00 : f32
      %64 = vector.broadcast %cst_36 : f32 to vector<16x128xf32>
      %65 = vector.broadcast %cst_37 : f32 to vector<16x128xf32>
      %66 = arith.select %57, %64, %65 : vector<16x128xi1>, vector<16x128xf32>
      %cst_38 = arith.constant 1.000000e+00 : f32
      %cst_39 = arith.constant 0.000000e+00 : f32
      %67 = vector.broadcast %cst_38 : f32 to vector<16x128xf32>
      %68 = vector.broadcast %cst_39 : f32 to vector<16x128xf32>
      %69 = arith.select %59, %67, %68 : vector<16x128xi1>, vector<16x128xf32>
      %70 = arith.addf %66, %69 : vector<16x128xf32>
      %c3 = arith.constant 3 : index
      %c0_40 = arith.constant 0 : index
      %71 = vector.load %arg5[%c3, %c0_40] : memref<8x128xf32, #tpu.memory_space<vmem>>, vector<1x128xf32>
      %cst_41 = arith.constant dense<0.000000e+00> : vector<128xf32>
      %72 = vector.multi_reduction <add>, %70, %cst_41 [0] : vector<16x128xf32> to vector<128xf32>
      %73 = vector.shape_cast %72 : vector<128xf32> to vector<1x128xf32>
      %74 = arith.addf %71, %73 : vector<1x128xf32>
      %c3_42 = arith.constant 3 : index
      %c0_43 = arith.constant 0 : index
      %75 = vector.load %arg5[%c3_42, %c0_43] : memref<8x128xf32, #tpu.memory_space<vmem>>, vector<1x128xf32>
      tpu.vector_store %arg5[%c3_42, %c0_43], %74 {strides = array<i32>} : memref<8x128xf32, #tpu.memory_space<vmem>>, vector<1x128xf32>,
      %c4 = arith.constant 4 : index
      %c0_44 = arith.constant 0 : index
      %76 = vector.load %arg5[%c4, %c0_44] : memref<8x128xf32, #tpu.memory_space<vmem>>, vector<1x128xf32>
      %cst_45 = arith.constant dense<0.000000e+00> : vector<128xf32>
      %77 = vector.multi_reduction <add>, %63, %cst_45 [0] : vector<16x128xf32> to vector<128xf32>
      %78 = vector.shape_cast %77 : vector<128xf32> to vector<1x128xf32>
      %79 = arith.addf %76, %78 : vector<1x128xf32>
      %c4_46 = arith.constant 4 : index
      %c0_47 = arith.constant 0 : index
      %80 = vector.load %arg5[%c4_46, %c0_47] : memref<8x128xf32, #tpu.memory_space<vmem>>, vector<1x128xf32>
      tpu.vector_store %arg5[%c4_46, %c0_47], %79 {strides = array<i32>} : memref<8x128xf32, #tpu.memory_space<vmem>>, vector<1x128xf32>,
    } else {
    }
    %true = arith.constant true
    %10 = arith.xori %7, %true : i1
    %11 = arith.extui %10 : i1 to i32
    %c0_i32_4 = arith.constant 0 : i32
    %12 = arith.cmpi ne, %11, %c0_i32_4 : i32
    scf.if %12 {
      %c16_i32_7 = arith.constant 16 : i32
      %16 = arith.subi %c16_i32_7, %5 : i32
      %17 = tpu.iota {dimensions = array<i32: 0>} : vector<16x128xi32>
      %18 = vector.broadcast %16 : i32 to vector<16x128xi32>
      %19 = arith.cmpi slt, %17, %18 : vector<16x128xi32>
      %c0 = arith.constant 0 : index
      %c0_8 = arith.constant 0 : index
      %20 = vector.load %arg2[%c0, %c0_8] : memref<16x128xf32, #tpu.memory_space<vmem>>, vector<16x128xf32>
      %cst = arith.constant 0.000000e+00 : f32
      %21 = vector.broadcast %cst : f32 to vector<16x128xf32>
      %22 = arith.select %19, %20, %21 : vector<16x128xi1>, vector<16x128xf32>
      %c0_9 = arith.constant 0 : index
      %c0_10 = arith.constant 0 : index
      %23 = vector.load %arg3[%c0_9, %c0_10] : memref<16x128xf32, #tpu.memory_space<vmem>>, vector<16x128xf32>
      %cst_11 = arith.constant 0.000000e+00 : f32
      %24 = vector.broadcast %cst_11 : f32 to vector<16x128xf32>
      %25 = arith.select %19, %23, %24 : vector<16x128xi1>, vector<16x128xf32>
      %26 = arith.subf %22, %25 : vector<16x128xf32>
      %cst_12 = arith.constant 6.000000e+00 : f32
      %27 = vector.broadcast %cst_12 : f32 to vector<16x128xf32>
      %28 = arith.mulf %25, %27 : vector<16x128xf32>
      %29 = math.exp %28 : vector<16x128xf32>
      %cst_13 = arith.constant 8.000000e-01 : f32
      %30 = vector.broadcast %cst_13 : f32 to vector<16x128xf32>
      %31 = arith.subf %29, %30 : vector<16x128xf32>
      %c0_14 = arith.constant 0 : index
      %c0_15 = arith.constant 0 : index
      %32 = vector.load %arg5[%c0_14, %c0_15] : memref<8x128xf32, #tpu.memory_space<vmem>>, vector<1x128xf32>
      %33 = arith.mulf %26, %26 : vector<16x128xf32>
      %34 = arith.mulf %33, %31 : vector<16x128xf32>
      %cst_16 = arith.constant dense<0.000000e+00> : vector<128xf32>
      %35 = vector.multi_reduction <add>, %34, %cst_16 [0] : vector<16x128xf32> to vector<128xf32>
      %36 = vector.shape_cast %35 : vector<128xf32> to vector<1x128xf32>
      %37 = arith.addf %32, %36 : vector<1x128xf32>
      %c0_17 = arith.constant 0 : index
      %c0_18 = arith.constant 0 : index
      %38 = vector.load %arg5[%c0_17, %c0_18] : memref<8x128xf32, #tpu.memory_space<vmem>>, vector<1x128xf32>
      tpu.vector_store %arg5[%c0_17, %c0_18], %37 {strides = array<i32>} : memref<8x128xf32, #tpu.memory_space<vmem>>, vector<1x128xf32>,
      %cst_19 = arith.constant 1.875000e-01 : f32
      %39 = vector.broadcast %cst_19 : f32 to vector<16x128xf32>
      %40 = arith.cmpf oge, %22, %39 : vector<16x128xf32>
      %cst_20 = arith.constant 1.875000e-01 : f32
      %41 = vector.broadcast %cst_20 : f32 to vector<16x128xf32>
      %42 = arith.cmpf oge, %25, %41 : vector<16x128xf32>
      %43 = arith.andi %40, %42 : vector<16x128xi1>
      %cst_21 = arith.constant 1.000000e+00 : f32
      %cst_22 = arith.constant 0.000000e+00 : f32
      %44 = vector.broadcast %cst_21 : f32 to vector<16x128xf32>
      %45 = vector.broadcast %cst_22 : f32 to vector<16x128xf32>
      %46 = arith.select %43, %44, %45 : vector<16x128xi1>, vector<16x128xf32>
      %cst_23 = arith.constant 1.000000e+00 : f32
      %cst_24 = arith.constant 0.000000e+00 : f32
      %47 = vector.broadcast %cst_23 : f32 to vector<16x128xf32>
      %48 = vector.broadcast %cst_24 : f32 to vector<16x128xf32>
      %49 = arith.select %40, %47, %48 : vector<16x128xi1>, vector<16x128xf32>
      %cst_25 = arith.constant 1.000000e+00 : f32
      %cst_26 = arith.constant 0.000000e+00 : f32
      %50 = vector.broadcast %cst_25 : f32 to vector<16x128xf32>
      %51 = vector.broadcast %cst_26 : f32 to vector<16x128xf32>
      %52 = arith.select %42, %50, %51 : vector<16x128xi1>, vector<16x128xf32>
      %53 = arith.addf %49, %52 : vector<16x128xf32>
      %c1 = arith.constant 1 : index
      %c0_27 = arith.constant 0 : index
      %54 = vector.load %arg5[%c1, %c0_27] : memref<8x128xf32, #tpu.memory_space<vmem>>, vector<1x128xf32>
      %cst_28 = arith.constant dense<0.000000e+00> : vector<128xf32>
      %55 = vector.multi_reduction <add>, %53, %cst_28 [0] : vector<16x128xf32> to vector<128xf32>
      %56 = vector.shape_cast %55 : vector<128xf32> to vector<1x128xf32>
      %57 = arith.addf %54, %56 : vector<1x128xf32>
      %c1_29 = arith.constant 1 : index
      %c0_30 = arith.constant 0 : index
      %58 = vector.load %arg5[%c1_29, %c0_30] : memref<8x128xf32, #tpu.memory_space<vmem>>, vector<1x128xf32>
      tpu.vector_store %arg5[%c1_29, %c0_30], %57 {strides = array<i32>} : memref<8x128xf32, #tpu.memory_space<vmem>>, vector<1x128xf32>,
      %c2 = arith.constant 2 : index
      %c0_31 = arith.constant 0 : index
      %59 = vector.load %arg5[%c2, %c0_31] : memref<8x128xf32, #tpu.memory_space<vmem>>, vector<1x128xf32>
      %cst_32 = arith.constant dense<0.000000e+00> : vector<128xf32>
      %60 = vector.multi_reduction <add>, %46, %cst_32 [0] : vector<16x128xf32> to vector<128xf32>
      %61 = vector.shape_cast %60 : vector<128xf32> to vector<1x128xf32>
      %62 = arith.addf %59, %61 : vector<1x128xf32>
      %c2_33 = arith.constant 2 : index
      %c0_34 = arith.constant 0 : index
      %63 = vector.load %arg5[%c2_33, %c0_34] : memref<8x128xf32, #tpu.memory_space<vmem>>, vector<1x128xf32>
      tpu.vector_store %arg5[%c2_33, %c0_34], %62 {strides = array<i32>} : memref<8x128xf32, #tpu.memory_space<vmem>>, vector<1x128xf32>,
      %cst_35 = arith.constant 4.375000e-01 : f32
      %64 = vector.broadcast %cst_35 : f32 to vector<16x128xf32>
      %65 = arith.cmpf oge, %22, %64 : vector<16x128xf32>
      %cst_36 = arith.constant 4.375000e-01 : f32
      %66 = vector.broadcast %cst_36 : f32 to vector<16x128xf32>
      %67 = arith.cmpf oge, %25, %66 : vector<16x128xf32>
      %68 = arith.andi %65, %67 : vector<16x128xi1>
      %cst_37 = arith.constant 1.000000e+00 : f32
      %cst_38 = arith.constant 0.000000e+00 : f32
      %69 = vector.broadcast %cst_37 : f32 to vector<16x128xf32>
      %70 = vector.broadcast %cst_38 : f32 to vector<16x128xf32>
      %71 = arith.select %68, %69, %70 : vector<16x128xi1>, vector<16x128xf32>
      %cst_39 = arith.constant 1.000000e+00 : f32
      %cst_40 = arith.constant 0.000000e+00 : f32
      %72 = vector.broadcast %cst_39 : f32 to vector<16x128xf32>
      %73 = vector.broadcast %cst_40 : f32 to vector<16x128xf32>
      %74 = arith.select %65, %72, %73 : vector<16x128xi1>, vector<16x128xf32>
      %cst_41 = arith.constant 1.000000e+00 : f32
      %cst_42 = arith.constant 0.000000e+00 : f32
      %75 = vector.broadcast %cst_41 : f32 to vector<16x128xf32>
      %76 = vector.broadcast %cst_42 : f32 to vector<16x128xf32>
      %77 = arith.select %67, %75, %76 : vector<16x128xi1>, vector<16x128xf32>
      %78 = arith.addf %74, %77 : vector<16x128xf32>
      %c3 = arith.constant 3 : index
      %c0_43 = arith.constant 0 : index
      %79 = vector.load %arg5[%c3, %c0_43] : memref<8x128xf32, #tpu.memory_space<vmem>>, vector<1x128xf32>
      %cst_44 = arith.constant dense<0.000000e+00> : vector<128xf32>
      %80 = vector.multi_reduction <add>, %78, %cst_44 [0] : vector<16x128xf32> to vector<128xf32>
      %81 = vector.shape_cast %80 : vector<128xf32> to vector<1x128xf32>
      %82 = arith.addf %79, %81 : vector<1x128xf32>
      %c3_45 = arith.constant 3 : index
      %c0_46 = arith.constant 0 : index
      %83 = vector.load %arg5[%c3_45, %c0_46] : memref<8x128xf32, #tpu.memory_space<vmem>>, vector<1x128xf32>
      tpu.vector_store %arg5[%c3_45, %c0_46], %82 {strides = array<i32>} : memref<8x128xf32, #tpu.memory_space<vmem>>, vector<1x128xf32>,
      %c4 = arith.constant 4 : index
      %c0_47 = arith.constant 0 : index
      %84 = vector.load %arg5[%c4, %c0_47] : memref<8x128xf32, #tpu.memory_space<vmem>>, vector<1x128xf32>
      %cst_48 = arith.constant dense<0.000000e+00> : vector<128xf32>
      %85 = vector.multi_reduction <add>, %71, %cst_48 [0] : vector<16x128xf32> to vector<128xf32>
      %86 = vector.shape_cast %85 : vector<128xf32> to vector<1x128xf32>
      %87 = arith.addf %84, %86 : vector<1x128xf32>
      %c4_49 = arith.constant 4 : index
      %c0_50 = arith.constant 0 : index
      %88 = vector.load %arg5[%c4_49, %c0_50] : memref<8x128xf32, #tpu.memory_space<vmem>>, vector<1x128xf32>
      tpu.vector_store %arg5[%c4_49, %c0_50], %87 {strides = array<i32>} : memref<8x128xf32, #tpu.memory_space<vmem>>, vector<1x128xf32>,
    } else {
    }
    %c0_i32_5 = arith.constant 0 : i32
    %13 = arith.cmpi eq, %arg1, %c0_i32_5 : i32
    %14 = arith.extui %13 : i1 to i32
    %c0_i32_6 = arith.constant 0 : i32
    %15 = arith.cmpi ne, %14, %c0_i32_6 : i32
    scf.if %15 {
      %c0 = arith.constant 0 : index
      %c0_7 = arith.constant 0 : index
      %16 = vector.load %arg5[%c0, %c0_7] : memref<8x128xf32, #tpu.memory_space<vmem>>, vector<8x128xf32>
      %17 = vector.shape_cast %16 : vector<8x128xf32> to vector<1x8x128xf32>
      %c0_8 = arith.constant 0 : index
      %c0_9 = arith.constant 0 : index
      %c0_10 = arith.constant 0 : index
      %18 = vector.load %arg4[%c0_8, %c0_9, %c0_10] : memref<1x8x128xf32, #tpu.memory_space<vmem>>, vector<1x8x128xf32>
      tpu.vector_store %arg4[%c0_8, %c0_9, %c0_10], %17 {strides = array<i32>} : memref<1x8x128xf32, #tpu.memory_space<vmem>>, vector<1x8x128xf32>,
    } else {
    }
    return
  }
  func.func @transform_0(%arg0: i32, %arg1: i32) -> (i32, i32) {
    %c1_i32 = arith.constant 1 : i32
    %0 = arith.muli %arg0, %c1_i32 : i32
    %1 = arith.addi %0, %arg1 : i32
    %c0_i32 = arith.constant 0 : i32
    %2 = arith.minsi %1, %c0_i32 : i32
    %c0_i32_0 = arith.constant 0 : i32
    %c0_i32_1 = arith.constant 0 : i32
    return %2, %c0_i32_0 : i32, i32
  }
  func.func @transform_1(%arg0: i32, %arg1: i32) -> (i32, i32) {
    %c1_i32 = arith.constant 1 : i32
    %0 = arith.muli %arg0, %c1_i32 : i32
    %1 = arith.addi %0, %arg1 : i32
    %c0_i32 = arith.constant 0 : i32
    %2 = arith.minsi %1, %c0_i32 : i32
    %c0_i32_0 = arith.constant 0 : i32
    %c0_i32_1 = arith.constant 0 : i32
    return %2, %c0_i32_0 : i32, i32
  }
  func.func @transform_2(%arg0: i32, %arg1: i32) -> (i32, i32, i32) {
    %c0_i32 = arith.constant 0 : i32
    %c0_i32_0 = arith.constant 0 : i32
    %c0_i32_1 = arith.constant 0 : i32
    return %arg0, %c0_i32, %c0_i32_0 : i32, i32, i32
  }
}

</mosaic_0001>

<bundles_post_ra>
// kernel: bexprmse_iou_loss.1
= control target key start
LH: loop header
LB: loop body
LE: loop exit
PB: predicated region body
PF: predicated region fallthrough
CT: control target
= control target key end

     0   :  { %v324_v0 = vmov 0.0   ;;  %s357_s0 = inlined_call_operand.vmem [shape: f32[16,128], index: 0, kind: input, shape index: {}]   ;;  %s358_s1 = inlined_call_operand.vmem [shape: f32[16,128], index: 1, kind: input, shape index: {}]   ;;  %s359_s2 = inlined_call_operand.vmem [shape: f32[1,8,128], index: 2, kind: output, shape index: {}]  }
   0x1   :  { %79 = vst [vmem:[#allocation2] sm:$0xff] %v324_v0  ;;  %v87_v1 = vld [vmem:[%s357_s0] sm:$0xff]  ;;  %v88_v2 = vld [vmem:[%s357_s0 + $0x8] sm:$0xff] }
   0x2   :  { %v89_v3 = vld [vmem:[%s358_s1] sm:$0xff]  ;;  %v90_v4 = vld [vmem:[%s358_s1 + $0x8] sm:$0xff]  ;;  %vm115_vm0 = vcmp.ge.f32.partialorder %v87_v1, 0.1875  ;;  %vm116_vm1 = vcmp.ge.f32.partialorder %v88_v2, 0.1875  ;;  %vm149_vm6 = vcmp.ge.f32.partialorder %v87_v1, 0.4375  ;;  %vm150_vm7 = vcmp.ge.f32.partialorder %v88_v2, 0.4375 }
   0x3   :  { %v93_v5 = vmul.f32 6.0, %v89_v3  ;;  %v94_v6 = vmul.f32 6.0, %v90_v4  ;;  %vm117_vm2 = vcmp.ge.f32.partialorder %v89_v3, 0.1875  ;;  %vm118_vm3 = vcmp.ge.f32.partialorder %v90_v4, 0.1875 }
   0x4   :  { %v123_v8 = vsel %vm115_vm0, 1.0, %v324_v0  ;;  %v124_v9 = vsel %vm116_vm1, 1.0, %v324_v0  ;;  %vm119_vm4 = vmand %vm115_vm0, %vm117_vm2  ;;  %v91_v10 = vsub.f32 %v87_v1, %v89_v3  ;;  %v125_v12 = vsel %vm117_vm2, 1.0, %v324_v0 }
   0x5   :  { %v95_v7 = vmul.f32 1.442695, %v93_v5  ;;  %v97_v11 = vmul.f32 1.442695, %v94_v6  ;;  %v126_v13 = vsel %vm118_vm3, 1.0, %v324_v0  ;;  %vm120_vm5 = vmand %vm116_vm1, %vm118_vm3  ;;  %v127_v14 = vadd.f32 %v125_v12, %v123_v8 }
   0x6   :  { %v128_v15 = vadd.f32 %v126_v13, %v124_v9  ;;  %v121_v16 = vsel %vm119_vm4, 1.0, %v324_v0  ;;  %v122_v17 = vsel %vm120_vm5, 1.0, %v324_v0  ;;  %v92_v18 = vsub.f32 %v88_v2, %v90_v4 }
   0x7   :  { %320 = vpow2.f32 %v95_v7  ;;  %v140_v20 = vadd.f32 %v122_v17, %v121_v16  ;;  %vm151_vm8 = vcmp.ge.f32.partialorder %v89_v3, 0.4375  ;;  %vm152_vm9 = vcmp.ge.f32.partialorder %v90_v4, 0.4375 }
   0x8   :  { %322 = vpow2.f32 %v97_v11  ;;  %v130_v19 = vadd.f32 %v128_v15, %v127_v14  ;;  %v157_v21 = vsel %vm149_vm6, 1.0, %v324_v0  ;;  %v158_v22 = vsel %vm150_vm7, 1.0, %v324_v0  ;;  %vm153_vm10 = vmand %vm149_vm6, %vm151_vm8  ;;  %v129_v54 = vld [vmem:[#allocation2 + $0x1] sm:$0x1]  ;;  %v139_v55 = vld [vmem:[#allocation2 + $0x2] sm:$0x1] }
   0x9   :  { %v141_v24 = vrot.slane %v140_v20, 4  ;;  %v159_v25 = vsel %vm151_vm8, 1.0, %v324_v0  ;;  %v160_v26 = vsel %vm152_vm9, 1.0, %v324_v0  ;;  %v102_v27 = vmul.f32 %v91_v10, %v91_v10  ;;  %vm154_vm11 = vmand %vm150_vm7, %vm152_vm9  ;;  %v163_v2 = vld [vmem:[#allocation2 + $0x3] sm:$0x1] }
   0xa   :  { %v131_v23 = vrot.slane %v130_v19, 4  ;;  %v161_v28 = vadd.f32 %v159_v25, %v157_v21  ;;  %v162_v29 = vadd.f32 %v160_v26, %v158_v22  ;;  %v155_v30 = vsel %vm153_vm10, 1.0, %v324_v0  ;;  %v173_v6 = vld [vmem:[#allocation2 + $0x4] sm:$0x1]  ;;  %v101_v13 = vld [vmem:[#allocation2] sm:$0x1] }
   0xb   :  { %v103_v32 = vmul.f32 %v92_v18, %v92_v18  ;;  %v142_v34 = vadd.f32 %v141_v24, %v140_v20  ;;  %v156_v35 = vsel %vm154_vm11, 1.0, %v324_v0 }
   0xc   :  { %v132_v33 = vadd.f32 %v131_v23, %v130_v19  ;;  %v164_v38 = vadd.f32 %v162_v29, %v161_v28  ;;  %v174_v39 = vadd.f32 %v156_v35, %v155_v30 }
   0xd   :  { %v321_v31 = vpop.eup %320  ;;  %v143_v42 = vrot.slane %v142_v34, 2 }
   0xe   :  { %v323_v36 = vpop.eup %322  ;;  %v315_v37 = vadd.f32 -0.8, %v321_v31  ;;  %v133_v41 = vrot.slane %v132_v33, 2  ;;  %v165_v44 = vrot.slane %v164_v38, 4  ;;  %v175_v45 = vrot.slane %v174_v39, 4 }
   0xf   :  { %v316_v40 = vadd.f32 -0.8, %v323_v36  ;;  %v144_v48 = vadd.f32 %v143_v42, %v142_v34 }
  0x10   :  { %v104_v43 = vmul.f32 %v315_v37, %v102_v27  ;;  %v134_v47 = vadd.f32 %v133_v41, %v132_v33  ;;  %v166_v49 = vadd.f32 %v165_v44, %v164_v38  ;;  %v176_v50 = vadd.f32 %v175_v45, %v174_v39 }
  0x11   :  { %v105_v46 = vmul.f32 %v316_v40, %v103_v32  ;;  %v145_v53 = vrot.slane %v144_v48, 1 }
  0x12   :  { %v135_v52 = vrot.slane %v134_v47, 1  ;;  %v167_v56 = vrot.slane %v166_v49, 2  ;;  %v177_v57 = vrot.slane %v176_v50, 2 }
  0x13   :  { %v106_v51 = vadd.f32 %v105_v46, %v104_v43  ;;  %v146_v60 = vadd.f32 %v145_v53, %v144_v48 }
  0x14   :  { %v136_v59 = vadd.f32 %v135_v52, %v134_v47  ;;  %v168_v61 = vadd.f32 %v167_v56, %v166_v49  ;;  %v178_v62 = vadd.f32 %v177_v57, %v176_v50 }
  0x15   :  { %v107_v58 = vrot.slane %v106_v51, 4  ;;  %v147_v1 = vadd.f32 %v146_v60, %v139_v55 }
  0x16   :  { %v137_v0 = vadd.f32 %v136_v59, %v129_v54  ;;  %v169_v3 = vrot.slane %v168_v61, 1  ;;  %v179_v4 = vrot.slane %v178_v62, 1 }
  0x17   :  { %v108_v63 = vadd.f32 %v107_v58, %v106_v51  ;;  %148 = vst [vmem:[#allocation2 + $0x2] sm:$0x1] %v147_v1 }
  0x18   :  { %138 = vst [vmem:[#allocation2 + $0x1] sm:$0x1] %v137_v0  ;;  %v170_v7 = vadd.f32 %v169_v3, %v168_v61  ;;  %v180_v8 = vadd.f32 %v179_v4, %v178_v62 }
  0x19   :  { %v109_v5 = vrot.slane %v108_v63, 2 }
  0x1a   :  { %v171_v10 = vadd.f32 %v170_v7, %v163_v2  ;;  %v181_v11 = vadd.f32 %v180_v8, %v173_v6 }
  0x1b   :  { %v110_v9 = vadd.f32 %v109_v5, %v108_v63 }
  0x1c   :  { %172 = vst [vmem:[#allocation2 + $0x3] sm:$0x1] %v171_v10 }
  0x1d   :  { %v111_v12 = vrot.slane %v110_v9, 1  ;;  %182 = vst [vmem:[#allocation2 + $0x4] sm:$0x1] %v181_v11 }
  0x1f   :  { %v112_v14 = vadd.f32 %v111_v12, %v110_v9 }
  0x21   :  { %v113_v15 = vadd.f32 %v112_v14, %v101_v13 }
  0x23   :  { %114 = vst [vmem:[#allocation2] sm:$0x1] %v113_v15 }
  0x2a   :  { %v297_v16 = vld [vmem:[#allocation2] sm:$0xff] }
  0x2b   :  { %298 = vst [vmem:[%s359_s2] sm:$0xff] %v297_v16 }

</bundles_post_ra>
